<compile_context>
chip_gen: v6e
topology: v6e:2x2x1
jax: 0.10.0
libtpu: 0.0.40
codegen_flags: <defaults>
</compile_context>

<pallas_src>
import math

import jax
import jax.numpy as jnp
from jax.experimental import pallas as pl
from jax.experimental.pallas import tpu as pltpu


def _round_up(x, m):
    return ((x + m - 1) // m) * m


def _looks_like_v7x():
    try:
        return "v7" in jax.devices()[0].device_kind.lower()
    except Exception:
        return False


def _fused_pattern_kernel(x_ref, wqk_ref, bqk_ref, wpc_ref, bcomb_ref, o_ref):
    """x_ref: (tm, Fin); folded weights are tiny constant blocks resident in VMEM.

    logits = x @ Wqk + bqk    (tm, K)
    w      = softmax(logits)  (tm, K)
    out    = w @ Wpc + bcomb  (tm, D)
    """
    f32 = jnp.float32
    x = x_ref[...].astype(f32)

    logits = jnp.dot(x, wqk_ref[...], preferred_element_type=f32) + bqk_ref[...]

    # numerically-stable softmax over K; the divide goes to the EUP slot
    m = jnp.max(logits, axis=-1, keepdims=True)
    p = jnp.exp(logits - m)
    w = p * pl.reciprocal(jnp.sum(p, axis=-1, keepdims=True), approx=True)

    out = jnp.dot(w, wpc_ref[...], preferred_element_type=f32) + bcomb_ref[...]
    o_ref[...] = out.astype(o_ref.dtype)


def pattern_encoder_forward(X, params, *, tm=None):
    """Forward of PatternEncoder_patternkeyv3 for hour_list == ["1"].

    X: (B, N, L, 12).  Returns (B, N, D).
    """
    B, N, L, Fin = X.shape
    f32 = jnp.float32
    wq = params["wq"].astype(f32)        # (Fin, D)  (already (in, out))
    bq = params["bq"].astype(f32)        # (D,)
    qm = params["qry_mat"].astype(f32)   # (D, K)
    pat = params["pattern"].astype(f32)  # (K, D)
    wfc = params["wfc"].astype(f32)      # (D, D)
    bfc = params["bfc"].astype(f32)      # (D,)
    wfin = params["wfin"].astype(f32)    # (D, D)
    bfin = params["bfin"].astype(f32)    # (D,)
    D = wq.shape[1]
    K = qm.shape[1]

    # ---- offline folding of the purely-linear chain (tiny one-time matmuls) ----
    hi = jax.lax.Precision.HIGHEST
    wqk = jnp.dot(wq, qm, precision=hi)                                    # (Fin, K)
    bqk = jnp.dot(bq, qm, precision=hi)                                    # (K,)
    wpc = jnp.dot(pat, jnp.dot(wfc, wfin, precision=hi), precision=hi)     # (K, D)
    bcomb = jnp.dot(bfc, wfin, precision=hi) + bfin                        # (D,)

    # Only the last timestep enters the output for h == 1 (exact equivalence).
    x_rows = X[:, :, L - 1, :].reshape(B * N, Fin).astype(f32)
    M = B * N

    # Row tile: as large as possible (cap 2048) to amortize per-step overhead;
    # only force >= 2 grid steps on v7x (2 TensorCores share the grid).
    if tm is None:
        tm = min(2048, _round_up(M, 8))
        if _looks_like_v7x() and M > 8:
            tm = min(tm, _round_up(pl.cdiv(M, 2), 8))
    else:
        tm = max(8, _round_up(int(tm), 8))

    grid_m = pl.cdiv(M, tm)
    m_pad = grid_m * tm
    if m_pad != M:
        # padded rows give finite (uniform-softmax) outputs and are sliced off
        x_rows = jnp.pad(x_rows, ((0, m_pad - M), (0, 0)))

    row = lambda v: v.reshape(1, -1)

    flops = 2 * m_pad * (Fin * K + K * D)
    bytes_accessed = 4 * (m_pad * (Fin + D) + Fin * K + K + K * D + D)
    cost = pl.CostEstimate(flops=flops,
                           transcendentals=m_pad * (K + 1),
                           bytes_accessed=bytes_accessed)

    def const_spec(shape):
        return pl.BlockSpec(shape, lambda i: (0, 0))

    out_rows = pl.pallas_call(
        _fused_pattern_kernel,
        out_shape=jax.ShapeDtypeStruct((m_pad, D), X.dtype),
        grid_spec=pltpu.PrefetchScalarGridSpec(
            num_scalar_prefetch=0,
            grid=(grid_m,),
            in_specs=[
                pl.BlockSpec((tm, Fin), lambda i: (i, 0)),  # x rows (tiled)
                const_spec((Fin, K)),                       # Wqk  (folded)
                const_spec((1, K)),                         # bqk  (folded)
                const_spec((K, D)),                         # Wpc  (folded)
                const_spec((1, D)),                         # bcomb(folded)
            ],
            out_specs=pl.BlockSpec((tm, D), lambda i: (i, 0)),
        ),
        compiler_params=pltpu.CompilerParams(
            dimension_semantics=("parallel",)),
        cost_estimate=cost,
    )(x_rows, wqk, row(bqk), wpc, row(bcomb))

    return out_rows[:M].reshape(B, N, D)


def init_params(key, fin, d, k, dtype=jnp.float32):
    """Deterministic init mirroring torch defaults (Linear: U(-1/sqrt(fan_in), ...);
    qry_mat / pattern: randn)."""
    ks = jax.random.split(key, 8)

    def linear(kw, kb, fan_in, fan_out):
        bound = 1.0 / math.sqrt(fan_in)
        w = jax.random.uniform(kw, (fan_in, fan_out), dtype, -bound, bound)  # (in, out)
        b = jax.random.uniform(kb, (fan_out,), dtype, -bound, bound)
        return w, b

    wq, bq = linear(ks[0], ks[1], fin, d)      # Qnet:    Linear(12, D)
    wfc, bfc = linear(ks[2], ks[3], d, d)      # FCnet:   Linear(D, D)   (h = 1)
    wfin, bfin = linear(ks[4], ks[5], d, d)    # final_FC Linear(D, D)   (one hour)
    qry_mat = jax.random.normal(ks[6], (d, k), dtype)   # (D*h, K) with h = 1
    pattern = jax.random.normal(ks[7], (k, d), dtype)   # pattern_dict[1]
    return dict(wq=wq, bq=bq, qry_mat=qry_mat, pattern=pattern,
                wfc=wfc, bfc=bfc, wfin=wfin, bfin=bfin)


if __name__ == "__main__":
    key = jax.random.PRNGKey(0)
    k_x, k_p = jax.random.split(key)

    # X: [B, N, L, 12] (Qnet is Linear(12, D)); pattern_dict = {1: (K, D)}.
    B, N, L, Fin = 2, 16, 8, 12
    D, K = 32, 16

    X = jax.random.normal(k_x, (B, N, L, Fin), jnp.float32)
    params = init_params(k_p, Fin, D, K)

    out = pattern_encoder_forward(X, params)
    out = jax.block_until_ready(out)
    assert out.shape == (B, N, D)

    # Pure-JAX reference replicating the literal (unfolded) PyTorch forward
    # for h == 1, computed at HIGHEST precision.
    hi = jax.lax.Precision.HIGHEST
    qry_full = jnp.einsum("bnlf,fd->bnld", X, params["wq"], precision=hi) + params["bq"]
    qry = qry_full.reshape(B, N, L // 1, D * 1)[:, :, -1, :]
    logits = jnp.einsum("dk,bnd->bnk", params["qry_mat"], qry, precision=hi)
    w = jax.nn.softmax(logits, axis=2)
    w_x = jnp.einsum("bnk,kd->bnd", w, params["pattern"], precision=hi)
    emb = jnp.dot(w_x, params["wfc"], precision=hi) + params["bfc"]
    ref = jnp.dot(emb, params["wfin"], precision=hi) + params["bfin"]

    # Tolerance covers MXU default-precision matmuls, the approximate EUP
    # reciprocal, and fp32 reassociation from the offline weight folding.
    err = float(jnp.max(jnp.abs(out - ref)))
    assert jnp.allclose(out, ref, atol=2e-2, rtol=2e-2), f"max abs err = {err}"

    print("KERNEL_OK")
</pallas_src>

<mosaic_0001>
module attributes {stable_mosaic.version = 11 : i64} {
  func.func @_fused_pattern_kernel(%arg0: i32, %arg1: memref<32x12xf32, #tpu.memory_space<vmem>>, %arg2: memref<12x16xf32, #tpu.memory_space<vmem>>, %arg3: memref<1x16xf32, #tpu.memory_space<vmem>>, %arg4: memref<16x32xf32, #tpu.memory_space<vmem>>, %arg5: memref<1x32xf32, #tpu.memory_space<vmem>>, %arg6: memref<32x32xf32, #tpu.memory_space<vmem>>) attributes {dimension_semantics = [#tpu.dimension_semantics<parallel>], iteration_bounds = array<i64: 1>, scalar_prefetch = 0 : i64, scratch_operands = 0 : i64, tpu.core_type = #tpu.core_type<tc>, window_params = [{transform_indices = @transform_0, window_bounds = array<i64: 32, 12>}, {pipeline_mode = #tpu.pipeline_mode<synchronous>, transform_indices = @transform_1, window_bounds = array<i64: 12, 16>}, {pipeline_mode = #tpu.pipeline_mode<synchronous>, transform_indices = @transform_2, window_bounds = array<i64: 1, 16>}, {pipeline_mode = #tpu.pipeline_mode<synchronous>, transform_indices = @transform_3, window_bounds = array<i64: 16, 32>}, {pipeline_mode = #tpu.pipeline_mode<synchronous>, transform_indices = @transform_4, window_bounds = array<i64: 1, 32>}, {transform_indices = @transform_5, window_bounds = array<i64: 32, 32>}]} {
    %c0 = arith.constant 0 : index
    %c0_0 = arith.constant 0 : index
    %0 = vector.load %arg1[%c0, %c0_0] : memref<32x12xf32, #tpu.memory_space<vmem>>, vector<32x12xf32>
    %c0_1 = arith.constant 0 : index
    %c0_2 = arith.constant 0 : index
    %1 = vector.load %arg2[%c0_1, %c0_2] : memref<12x16xf32, #tpu.memory_space<vmem>>, vector<12x16xf32>
    %cst = arith.constant dense<0.000000e+00> : vector<32x16xf32>
    %2 = tpu.matmul %0, %1, %cst {dimension_numbers = #tpu.dot_dimension_numbers<[1], [0], [0], [1], [0, 0, 1, 1], [], []>} : vector<32x12xf32>, vector<12x16xf32>, vector<32x16xf32> -> vector<32x16xf32>
    %c0_3 = arith.constant 0 : index
    %c0_4 = arith.constant 0 : index
    %3 = vector.load %arg3[%c0_3, %c0_4] : memref<1x16xf32, #tpu.memory_space<vmem>>, vector<1x16xf32>
    %4 = vector.broadcast %3 : vector<1x16xf32> to vector<32x16xf32>
    %5 = arith.addf %2, %4 : vector<32x16xf32>
    %cst_5 = arith.constant dense<0xFF800000> : vector<32xf32>
    %6 = vector.multi_reduction <maximumf>, %5, %cst_5 [1] : vector<32x16xf32> to vector<32xf32>
    %7 = vector.shape_cast %6 : vector<32xf32> to vector<32x1xf32>
    %8 = vector.broadcast %7 : vector<32x1xf32> to vector<32x16xf32>
    %9 = arith.subf %5, %8 : vector<32x16xf32>
    %10 = math.exp %9 : vector<32x16xf32>
    %cst_6 = arith.constant dense<0.000000e+00> : vector<32xf32>
    %11 = vector.multi_reduction <add>, %10, %cst_6 [1] : vector<32x16xf32> to vector<32xf32>
    %12 = vector.shape_cast %11 : vector<32xf32> to vector<32x1xf32>
    %13 = tpu.reciprocal %12 {approx = true} : vector<32x1xf32> -> vector<32x1xf32>
    %14 = vector.broadcast %13 : vector<32x1xf32> to vector<32x16xf32>
    %15 = arith.mulf %10, %14 : vector<32x16xf32>
    %c0_7 = arith.constant 0 : index
    %c0_8 = arith.constant 0 : index
    %16 = vector.load %arg4[%c0_7, %c0_8] : memref<16x32xf32, #tpu.memory_space<vmem>>, vector<16x32xf32>
    %cst_9 = arith.constant dense<0.000000e+00> : vector<32x32xf32>
    %17 = tpu.matmul %15, %16, %cst_9 {dimension_numbers = #tpu.dot_dimension_numbers<[1], [0], [0], [1], [0, 0, 1, 1], [], []>} : vector<32x16xf32>, vector<16x32xf32>, vector<32x32xf32> -> vector<32x32xf32>
    %c0_10 = arith.constant 0 : index
    %c0_11 = arith.constant 0 : index
    %18 = vector.load %arg5[%c0_10, %c0_11] : memref<1x32xf32, #tpu.memory_space<vmem>>, vector<1x32xf32>
    %19 = vector.broadcast %18 : vector<1x32xf32> to vector<32x32xf32>
    %20 = arith.addf %17, %19 : vector<32x32xf32>
    %c0_12 = arith.constant 0 : index
    %c0_13 = arith.constant 0 : index
    %21 = vector.load %arg6[%c0_12, %c0_13] : memref<32x32xf32, #tpu.memory_space<vmem>>, vector<32x32xf32>
    tpu.vector_store %arg6[%c0_12, %c0_13], %20 {strides = array<i32>} : memref<32x32xf32, #tpu.memory_space<vmem>>, vector<32x32xf32>,
    return
  }
  func.func @transform_0(%arg0: i32) -> (i32, i32) {
    %c0_i32 = arith.constant 0 : i32
    %c0_i32_0 = arith.constant 0 : i32
    return %arg0, %c0_i32 : i32, i32
  }
  func.func @transform_1(%arg0: i32) -> (i32, i32) {
    %c0_i32 = arith.constant 0 : i32
    %c0_i32_0 = arith.constant 0 : i32
    %c0_i32_1 = arith.constant 0 : i32
    return %c0_i32, %c0_i32_0 : i32, i32
  }
  func.func @transform_2(%arg0: i32) -> (i32, i32) {
    %c0_i32 = arith.constant 0 : i32
    %c0_i32_0 = arith.constant 0 : i32
    %c0_i32_1 = arith.constant 0 : i32
    return %c0_i32, %c0_i32_0 : i32, i32
  }
  func.func @transform_3(%arg0: i32) -> (i32, i32) {
    %c0_i32 = arith.constant 0 : i32
    %c0_i32_0 = arith.constant 0 : i32
    %c0_i32_1 = arith.constant 0 : i32
    return %c0_i32, %c0_i32_0 : i32, i32
  }
  func.func @transform_4(%arg0: i32) -> (i32, i32) {
    %c0_i32 = arith.constant 0 : i32
    %c0_i32_0 = arith.constant 0 : i32
    %c0_i32_1 = arith.constant 0 : i32
    return %c0_i32, %c0_i32_0 : i32, i32
  }
  func.func @transform_5(%arg0: i32) -> (i32, i32) {
    %c0_i32 = arith.constant 0 : i32
    %c0_i32_0 = arith.constant 0 : i32
    return %arg0, %c0_i32 : i32, i32
  }
}

</mosaic_0001>

<bundles_post_ra>
// kernel: tpu_custom_call.1
= control target key start
LH: loop header
LB: loop body
LE: loop exit
PB: predicated region body
PF: predicated region fallthrough
CT: control target
= control target key end

     0   :  { %vm47_vm0 = vcmask 1043456   ;;  %vm34_vm1 = vcmask 97280   ;;  %s470_s0 = inlined_call_operand.vmem [shape: f32[32,12], index: 0, kind: input, shape index: {}]   ;;  %s471_s1 = inlined_call_operand.vmem [shape: f32[12,16], index: 1, kind: input, shape index: {}]   ;;  %s472_s2 = inlined_call_operand.vmem [shape: f32[1,16], index: 2, kind: input, shape index: {}]   ;;  %s473_s3 = inlined_call_operand.vmem [shape: f32[16,32], index: 3, kind: input, shape index: {}]   ;;  %s474_s4 = inlined_call_operand.vmem [shape: f32[1,32], index: 4, kind: input, shape index: {}]   ;;  %s475_s5 = inlined_call_operand.hbm [shape: f32[32,32], index: 5, kind: output, shape index: {}]  }
   0x1   :  { %v26_v0 = vld [vmem:[%s471_s1 + $0x8] sm:$0xf]  ;;  %v25_v1 = vld [vmem:[%s471_s1] sm:$0xff] }
   0x2   :  { %v21_v2 = vld [vmem:[%s470_s0] sm:$0xff]  ;;  %331 = vmatprep.subr.msk.mxu0 %vm47_vm0, %v26_v0  ;;  %v22_v3 = vld [vmem:[%s470_s0 + $0x8] sm:$0xff] }
   0x3   :  { %335 = vmatprep.mubr.msk.f32.mxu0 %vm34_vm1, %v21_v2  ;;  %332 = vmatpush3.msk.msra.mxu0 %vm47_vm0, %v26_v0 }
   0x4   :  { %10 = vsyncpa [#allocation3], 0  ;;  %333 = vmatprep.subr.mxu0 %v25_v1  ;;  %v23_v4 = vld [vmem:[%s470_s0 + $0x10] sm:$0xff]  ;;  %v24_v5 = vld [vmem:[%s470_s0 + $0x18] sm:$0xff]  ;;  %vm136_vm2 = vcmask 130048   ;;  %vm287_vm3 = vcmask 261120  }
   0x5   :  { %334 = vmatpush3.msra.mxu0 %v25_v1  ;;  %v308_v7 = vld [vmem:[%s472_s2] ss:$0 sm:$0xff]  ;;  %v182_v39 = vld [vmem:[%s473_s3 + $0x8] sm:$0xff]  ;;  %s392_s9 = smov [#allocation2]  }
   0x6   :  { %336 = vmatmul.mubr.msk.f32.vlgmr.msra.gmra.mxu0 %vm34_vm1, %v22_v3  ;;  %341 = vmatprep.subr.mxu1 %v182_v39  ;;  %v181_v40 = vld [vmem:[%s473_s3] sm:$0xff]  ;;  %s297_s10 = sshll.u32 %s392_s9, 4  ;;  %s298_s10 = int_to_ptr.vmem [resolvable:$true] %s297_s10 }
   0x7   :  { %338 = vmatprep.mubr.msk.f32.mxu0 %vm34_vm1, %v23_v4  ;;  %342 = vmatpush3.msra.mxu1 %v182_v39  ;;  %v314_v53 = vld [vmem:[%s474_s4] ss:$0 sm:$0xff]  ;;  %s370_s11 = scalar_lea.vmem %s298_s10, 512  ;;  %p375_p1 = scmp.lt.s32.totalorder %s298_s10, %s298_s10 }
   0x8   :  { %343 = vmatprep.subr.mxu1 %v181_v40  ;;  %p371_p0 = scmp.ne.s32.totalorder %s298_s10, %s370_s11  ;;  %p376_p2 = scmp.lt.s32.totalorder %s370_s11, %s370_s11 }
   0x9   :  { %344 = vmatpush3.msra.mxu1 %v181_v40 }
   0xa   :  { %339 = vmatmul.mubr.msk.f32.gmra.mxu0 %vm34_vm1, %v24_v5  ;;  %p377_p3 = por %p376_p2, %p375_p1 }
   0xc   :  { %p378_p4 = pnand %p377_p3, %p371_p0 }
  0xc6   :  { %v337_v6 = vpop.f32.mrf.mxu0 }
  0xc7   :  { %v123_v11 = vadd.f32 %v337_v6, %v308_v7 }
  0xc8   :  { %v117_v8 = vpop.f32.mrf.mxu0 }
  0xc9   :  { %v118_v9 = vadd.f32 %v308_v7, %v117_v8  ;;  %v140_v17 = vsel %vm136_vm2, %v123_v11, -inf }
  0xca   :  { %v340_v10 = vpop.f32.mrf.mxu0 }
  0xcb   :  { %v137_v12 = vsel %vm136_vm2, %v118_v9, -inf  ;;  %v133_v15 = vadd.f32 %v340_v10, %v308_v7 }
  0xcc   :  { %v127_v13 = vpop.f32.mrf.mxu0  ;;  %138 = vmax.xlane.f32.xlu0 %v137_v12 }
  0xcd   :  { %v128_v14 = vadd.f32 %v308_v7, %v127_v13  ;;  %v146_v18 = vsel %vm136_vm2, %v133_v15, -inf }
  0xcf   :  { %v143_v16 = vsel %vm136_vm2, %v128_v14, -inf }
  0xd0   :  { %144 = vmax.xlane.f32.xlu1 %v143_v16  ;;  %141 = vmax.xlane.f32.xlu0 %v140_v17 }
  0xd4   :  { %147 = vmax.xlane.f32.xlu1 %v146_v18 }
 0x155   :  { %v139_v19 = vpop.xlane.xlu0 %138 }
 0x156   :  { %v149_v20 = vsub.f32 %v118_v9, %v139_v19 }
 0x158   :  { %v153_v21 = vmul.f32 1.442695, %v149_v20 }
 0x159   :  { %v145_v22 = vpop.xlane.xlu1 %144  ;;  %v142_v23 = vpop.xlane.xlu0 %141 }
 0x15a   :  { %354 = vpow2.f32 %v153_v21  ;;  %v151_v24 = vsub.f32 %v128_v14, %v145_v22  ;;  %v150_v25 = vsub.f32 %v123_v11, %v142_v23 }
 0x15c   :  { %v157_v26 = vmul.f32 1.442695, %v151_v24  ;;  %v155_v27 = vmul.f32 1.442695, %v150_v25 }
 0x15d   :  { %v148_v28 = vpop.xlane.xlu1 %147 }
 0x15e   :  { %356 = vpow2.f32 %v157_v26  ;;  %v152_v29 = vsub.f32 %v133_v15, %v148_v28 }
 0x15f   :  { %358 = vpow2.f32 %v155_v27 }
 0x160   :  { %v159_v30 = vmul.f32 1.442695, %v152_v29 }
 0x162   :  { %360 = vpow2.f32 %v159_v30 }
 0x167   :  { %v355_v31 = vpop.eup %354 }
 0x168   :  { %v161_v32 = vsel %vm136_vm2, %v355_v31, 0.0 }
 0x169   :  { %162 = vadd.xlane.f32.xlu0 %v161_v32 }
 0x16b   :  { %v357_v33 = vpop.eup %356 }
 0x16c   :  { %v359_v34 = vpop.eup %358  ;;  %v167_v35 = vsel %vm136_vm2, %v357_v33, 0.0 }
 0x16d   :  { %168 = vadd.xlane.f32.xlu0 %v167_v35  ;;  %v164_v36 = vsel %vm136_vm2, %v359_v34, 0.0 }
 0x16e   :  { %165 = vadd.xlane.f32.xlu1 %v164_v36 }
 0x16f   :  { %v361_v37 = vpop.eup %360 }
 0x170   :  { %v170_v38 = vsel %vm136_vm2, %v361_v37, 0.0 }
 0x172   :  { %171 = vadd.xlane.f32.xlu1 %v170_v38 }
 0x1f2   :  { %v163_v41 = vpop.xlane.xlu0 %162 }
 0x1f3   :  { %362 = vrcp.f32 %v163_v41 }
 0x1f6   :  { %v169_v42 = vpop.xlane.xlu0 %168 }
 0x1f7   :  { %v166_v43 = vpop.xlane.xlu1 %165  ;;  %364 = vrcp.f32 %v169_v42 }
 0x1f8   :  { %366 = vrcp.f32 %v166_v43 }
 0x1fb   :  { %v172_v44 = vpop.xlane.xlu1 %171 }
 0x1fc   :  { %368 = vrcp.f32 %v172_v44 }
 0x200   :  { %v363_v45 = vpop.eup %362 }
 0x201   :  { %v177_v46 = vmul.f32 %v363_v45, %v355_v31 }
 0x203   :  { %345 = vmatprep.mubr.msk.f32.mxu1 %vm136_vm2, %v177_v46 }
 0x204   :  { %v365_v47 = vpop.eup %364 }
 0x205   :  { %v367_v48 = vpop.eup %366  ;;  %v179_v49 = vmul.f32 %v365_v47, %v357_v33 }
 0x206   :  { %v178_v50 = vmul.f32 %v367_v48, %v359_v34 }
 0x208   :  { %346 = vmatmul.mubr.msk.f32.vlgmr.msra.gmra.mxu1 %vm136_vm2, %v178_v50 }
 0x209   :  { %v369_v51 = vpop.eup %368  ;;  %348 = vmatprep.mubr.msk.f32.mxu1 %vm136_vm2, %v179_v49 }
 0x20a   :  { %v180_v52 = vmul.f32 %v369_v51, %v361_v37 }
 0x20c   :  { %349 = vmatmul.mubr.msk.f32.gmra.mxu1 %vm136_vm2, %v180_v52 }
 0x2c8   :  { %v347_v54 = vpop.f32.mrf.mxu1 }
 0x2c9   :  { %v274_v55 = vadd.f32 %v347_v54, %v314_v53 }
 0x2ca   :  { %v268_v56 = vpop.f32.mrf.mxu1 }
 0x2cb   :  { %289 = vst.msk [vmem:[#allocation2 + $0x8] sm:$0xff] %vm287_vm3, %v274_v55  ;;  %v269_v57 = vadd.f32 %v314_v53, %v268_v56 }
 0x2cc   :  { %v350_v58 = vpop.f32.mrf.mxu1 }
 0x2cd   :  { %288 = vst.msk [vmem:[#allocation2] sm:$0xff] %vm287_vm3, %v269_v57  ;;  %v284_v59 = vadd.f32 %v350_v58, %v314_v53 }
 0x2ce   :  { %v278_v60 = vpop.f32.mrf.mxu1 }
 0x2cf   :  { %291 = vst.msk [vmem:[#allocation2 + $0x18] sm:$0xff] %vm287_vm3, %v284_v59  ;;  %v279_v61 = vadd.f32 %v314_v53, %v278_v60 }
 0x2d1   :  { %290 = vst.msk [vmem:[#allocation2 + $0x10] sm:$0xff] %vm287_vm3, %v279_v61 }
 0x2d2   :  { %381 = shalt.err (!%p378_p4)
}
 0x2d3   :  { %s393_s4 = smov 128   ;;  %s394_s12 = smov 8  }
 0x2d4   :  { %303 = dma.vmem_to_hbm [thread:$0]  %s298_s10, 512, %s475_s5, [#allocation3], %s393_s4, %s393_s4, %s394_s12  }
 0x2d5   :  { %390 = dma.done.wait [#allocation3], 512  }
 0x2d6   :  { %391 = vsyncadd [#allocation3], 4294966784 }
 0x2d7   :  { %307 = vsyncpa [#allocation3], 1 }

</bundles_post_ra>
